<compile_context>
chip_gen: v7x
topology: tpu7x:2x2x1
jax: 0.10.0
libtpu: 0.0.40
codegen_flags: <defaults>
</compile_context>

<pallas_src>
import functools

import jax
import jax.numpy as jnp
from jax import lax
from jax.experimental import pallas as pl
from jax.experimental.pallas import tpu as pltpu  # noqa: F401  (TPU backend)


# Contract lhs dim 1 with rhs dim 1: the MXU's native "NT" matmul form.
_NT_DIMS = (((1,), (1,)), ((), ()))


def _elu(x):
    # ELU(alpha=1): x if x > 0 else exp(x) - 1  (clamp arg so the dead branch
    # of jnp.where never overflows).
    return jnp.where(x > 0, x, jnp.exp(jnp.minimum(x, 0.0)) - 1.0)


def _surname_kernel(dims, apply_softmax, x_ref, wconv_ref, fc_ref, out_ref):
    B, C_in, L, C, K = dims
    kc_max = wconv_ref.shape[1] - 1          # weight rows; the last row is the bias

    def conv_elu(slab, layer, kc):
        """One conv layer as a single 2-D MXU matmul + bias + ELU."""
        wb = wconv_ref[layer]                # (kc_max+1, C), one VMEM load
        w = wb[:kc, :]                       # (kc, C)      weight (zero-pad rows inert)
        b = wb[kc_max:kc_max + 1, :]         # (1, C)       bias, added once per layer
        y = jnp.dot(slab, w, preferred_element_type=jnp.float32) + b
        return _elu(y)

    # ---- in-kernel transpose of the input (no wrapper dispatch) ----------
    # x arrives as (B*C_in, L); xt[t, b*C_in + c] = x[b*C_in + c, t].
    x2d = x_ref[...]                                            # (B*C_in, L)
    rows = lax.broadcasted_iota(jnp.int32, (L, L), 0)
    cols = lax.broadcasted_iota(jnp.int32, (L, L), 1)
    eye = (rows == cols).astype(jnp.float32)
    xt = lax.dot_general(eye, x2d, _NT_DIMS,
                         preferred_element_type=jnp.float32)    # (L, B*C_in)

    # ---- layer 1: kernel=3, stride=1 --------------------------------------
    l1 = L - K + 1
    slabs = []
    for b in range(B):
        xb = xt[:, b * C_in:(b + 1) * C_in]                     # (L, C_in)
        slabs.append(jnp.concatenate([xb[k:k + l1, :] for k in range(K)], axis=-1))
    h1 = conv_elu(jnp.concatenate(slabs, axis=0), 0, K * C_in)  # (B*l1, C)

    # ---- layer 2: kernel=3, stride=2, computed densely at stride 1 --------
    # h2f[v] is the stride-1 conv; the true stride-2 output is h2[u] = h2f[2u].
    # Layer 3 reads h2f with dilated taps instead of subsampling.
    l2f = l1 - K + 1
    slabs = []
    for b in range(B):
        hb = h1[b * l1:(b + 1) * l1, :]
        slabs.append(jnp.concatenate([hb[k:k + l2f, :] for k in range(K)], axis=-1))
    h2f = conv_elu(jnp.concatenate(slabs, axis=0), 1, K * C)    # (B*l2f, C)

    # ---- layer 3: kernel=3, stride=2 over h2  ==  taps h2f[4t + 2k] --------
    l2 = (l1 - K) // 2 + 1
    l3 = (l2 - K) // 2 + 1
    slabs = []
    for b in range(B):
        hb = h2f[b * l2f:(b + 1) * l2f, :]
        taps = []
        for k in range(K):
            taps.append(jnp.concatenate(
                [hb[4 * t + 2 * k:4 * t + 2 * k + 1, :] for t in range(l3)], axis=0))
        slabs.append(jnp.concatenate(taps, axis=-1))
    h3 = conv_elu(jnp.concatenate(slabs, axis=0), 2, K * C)     # (B*l3, C)

    # ---- layer 4: kernel=3, stride=1, l_out == 1  (== .squeeze(dim=2)) -----
    slabs = []
    for b in range(B):
        hb = h3[b * l3:(b + 1) * l3, :]
        slabs.append(jnp.concatenate([hb[k:k + 1, :] for k in range(K)], axis=-1))
    feats = conv_elu(jnp.concatenate(slabs, axis=0), 3, K * C)  # (B, C)

    # ---- fc (+ optional softmax) -------------------------------------------
    fc = fc_ref[...]                                            # (C+1, classes)
    logits = jnp.dot(feats, fc[:C, :],
                     preferred_element_type=jnp.float32) + fc[C:C + 1, :]
    if apply_softmax:                                           # F.softmax(dim=1)
        m = jnp.max(logits, axis=1, keepdims=True)
        e = jnp.exp(logits - m)
        s = jnp.sum(e, axis=1, keepdims=True)
        # Exact reciprocal kept (approx=True would use the idle EUP but was not
        # validated against the 1e-4 parity tolerance).
        logits = e * pl.reciprocal(s)
    out_ref[...] = logits.astype(out_ref.dtype)


def prepare_params(params):
    """One-time (hoisted) packing of PyTorch-layout params into 2 kernel operands.

    params = ((w1,b1),(w2,b2),(w3,b3),(w4,b4),(wfc,bfc)) with conv weight
    (Cout, Cin, K), conv bias (Cout,), fc weight (classes, C), fc bias (classes,).

    Returns:
      wconv: (4, kc_max+1, C)  rows 0..kc_max-1 = (K*Cin, Cout) weight (zero-padded),
                               row kc_max = bias.
      fc:    (C+1, classes)    rows 0..C-1 = wfc^T, row C = bfc.
    """
    (w1, b1), (w2, b2), (w3, b3), (w4, b4), (wfc, bfc) = params
    convs = [(w1, b1), (w2, b2), (w3, b3), (w4, b4)]

    def flat_w(w):   # (Cout, Cin, K) -> (K*Cin, Cout), contraction (k major, c minor)
        cout, cin, k = w.shape
        return jnp.transpose(w, (2, 1, 0)).reshape(k * cin, cout).astype(jnp.float32)

    kc_max = max(w.shape[1] * w.shape[2] for w, _ in convs)

    def pack(w, b):
        wf = flat_w(w)
        wf = jnp.pad(wf, ((0, kc_max - wf.shape[0]), (0, 0)))     # zero rows are inert
        return jnp.concatenate([wf, b.reshape(1, -1).astype(jnp.float32)], axis=0)

    wconv = jnp.stack([pack(w, b) for w, b in convs], axis=0)     # (4, kc_max+1, C)
    fc = jnp.concatenate([jnp.transpose(wfc).astype(jnp.float32),
                          bfc.reshape(1, -1).astype(jnp.float32)], axis=0)  # (C+1, cls)
    return wconv, fc


@functools.partial(jax.jit, static_argnames=("apply_softmax",))
def surname_classifier_forward(x_ncl, prepared, apply_softmax=False):
    """x_ncl: (B, C_in, L) like nn.Conv1d. prepared = prepare_params(params)."""
    wconv, fc = prepared
    B, C_in, L = x_ncl.shape
    C = wconv.shape[-1]
    K = 3
    num_classes = fc.shape[-1]

    # Static check mirroring the module's implicit assumption that the conv
    # stack reduces the length to exactly 1 before .squeeze(dim=2).
    l1 = L - K + 1
    l2 = (l1 - K) // 2 + 1
    l3 = (l2 - K) // 2 + 1
    l4 = l3 - K + 1
    if l4 != 1:
        raise ValueError(f"conv stack must reduce length to 1, got {l4} (L={L})")

    # Layout-preserving (free) reshape; the real transpose happens in-kernel.
    x2d = x_ncl.reshape(B * C_in, L).astype(jnp.float32)
    kernel = functools.partial(_surname_kernel, (B, C_in, L, C, K), apply_softmax)
    # Tiny problem: everything fits in VMEM, so no grid -- each operand is a
    # single full-array block (default BlockSpec); 3 input DMAs total.
    return pl.pallas_call(
        kernel,
        out_shape=jax.ShapeDtypeStruct((B, num_classes), jnp.float32),
    )(x2d, wconv, fc)


def _ref_forward(x, params, apply_softmax=False):
    """Pure-JAX reference with PyTorch NCL conv semantics."""
    def conv(x, w, b, stride):
        y = lax.conv_general_dilated(x, w, (stride,), 'VALID',
                                     dimension_numbers=('NCH', 'OIH', 'NCH'))
        return y + b[None, :, None]

    (w1, b1), (w2, b2), (w3, b3), (w4, b4), (wfc, bfc) = params
    h = _elu(conv(x, w1, b1, 1))
    h = _elu(conv(h, w2, b2, 2))
    h = _elu(conv(h, w3, b3, 2))
    h = _elu(conv(h, w4, b4, 1))
    feats = h[:, :, 0]                      # squeeze(dim=2)
    out = feats @ wfc.T + bfc
    if apply_softmax:
        out = jax.nn.softmax(out, axis=1)
    return out


if __name__ == "__main__":
    # Module hyperparameters: initial_num_channels=8, num_channels=32,
    # num_classes=10, surname length 17 (so the conv stack reduces L to 1).
    B, C_IN, L = 2, 8, 17
    NUM_CHANNELS, NUM_CLASSES = 32, 10

    key = jax.random.PRNGKey(0)
    keys = jax.random.split(key, 11)

    def conv_param(kw, kb, cout, cin, ksz):
        bound = 1.0 / (cin * ksz) ** 0.5
        w = jax.random.uniform(kw, (cout, cin, ksz), jnp.float32, -bound, bound)
        b = jax.random.uniform(kb, (cout,), jnp.float32, -bound, bound)
        return w, b

    p1 = conv_param(keys[0], keys[1], NUM_CHANNELS, C_IN, 3)
    p2 = conv_param(keys[2], keys[3], NUM_CHANNELS, NUM_CHANNELS, 3)
    p3 = conv_param(keys[4], keys[5], NUM_CHANNELS, NUM_CHANNELS, 3)
    p4 = conv_param(keys[6], keys[7], NUM_CHANNELS, NUM_CHANNELS, 3)
    fc_bound = 1.0 / NUM_CHANNELS ** 0.5
    wfc = jax.random.uniform(keys[8], (NUM_CLASSES, NUM_CHANNELS),
                             jnp.float32, -fc_bound, fc_bound)
    bfc = jax.random.uniform(keys[9], (NUM_CLASSES,),
                             jnp.float32, -fc_bound, fc_bound)
    params = (p1, p2, p3, p4, (wfc, bfc))

    # Constant weight packing hoisted out of the per-call hot path.
    prepared = prepare_params(params)

    x = jax.random.normal(keys[10], (B, C_IN, L), jnp.float32)

    # logits path (apply_softmax=False, the default)
    out = jax.block_until_ready(surname_classifier_forward(x, prepared))
    ref = _ref_forward(x, params)
    assert out.shape == (B, NUM_CLASSES)
    assert jnp.allclose(out, ref, atol=1e-4, rtol=1e-4)

    # softmax path (apply_softmax=True)
    out_sm = jax.block_until_ready(
        surname_classifier_forward(x, prepared, apply_softmax=True))
    assert jnp.allclose(jnp.sum(out_sm, axis=1), jnp.ones((B,)), atol=1e-4)
    assert jnp.allclose(out_sm, _ref_forward(x, params, apply_softmax=True),
                        atol=1e-4, rtol=1e-4)

    print("KERNEL_OK")
</pallas_src>

<mosaic_0001>
module attributes {stable_mosaic.version = 11 : i64} {
  func.func @_surname_kernel(%arg0: memref<16x17xf32, #tpu.memory_space<vmem>>, %arg1: memref<4x97x32xf32, #tpu.memory_space<vmem>>, %arg2: memref<33x10xf32, #tpu.memory_space<vmem>>, %arg3: memref<2x10xf32, #tpu.memory_space<vmem>>) attributes {dimension_semantics = [], scalar_prefetch = 0 : i64, scratch_operands = 0 : i64, tpu.core_type = #tpu.core_type<tc>} {
    %c0 = arith.constant 0 : index
    %c0_0 = arith.constant 0 : index
    %0 = vector.load %arg0[%c0, %c0_0] : memref<16x17xf32, #tpu.memory_space<vmem>>, vector<16x17xf32>
    %1 = tpu.iota {dimensions = array<i32: 0>} : vector<17x17xi32>
    %2 = tpu.iota {dimensions = array<i32: 1>} : vector<17x17xi32>
    %3 = arith.cmpi eq, %1, %2 : vector<17x17xi32>
    %4 = arith.extui %3 : vector<17x17xi1> to vector<17x17xi32>
    %5 = arith.sitofp %4 : vector<17x17xi32> to vector<17x17xf32>
    %cst = arith.constant dense<0.000000e+00> : vector<17x16xf32>
    %6 = tpu.matmul %5, %0, %cst {dimension_numbers = #tpu.dot_dimension_numbers<[1], [1], [0], [0], [0, 0, 1, 0], [], []>} : vector<17x17xf32>, vector<16x17xf32>, vector<17x16xf32> -> vector<17x16xf32>
    %7 = vector.extract_strided_slice %6 {offsets = [0, 0], sizes = [17, 8], strides = [1, 1]} : vector<17x16xf32> to vector<17x8xf32>
    %8 = vector.extract_strided_slice %7 {offsets = [0, 0], sizes = [15, 8], strides = [1, 1]} : vector<17x8xf32> to vector<15x8xf32>
    %9 = vector.extract_strided_slice %7 {offsets = [1, 0], sizes = [15, 8], strides = [1, 1]} : vector<17x8xf32> to vector<15x8xf32>
    %10 = vector.extract_strided_slice %7 {offsets = [2, 0], sizes = [15, 8], strides = [1, 1]} : vector<17x8xf32> to vector<15x8xf32>
    %11 = tpu.concatenate %8, %9, %10 in 1 : vector<15x8xf32>, vector<15x8xf32>, vector<15x8xf32> -> vector<15x24xf32>
    %12 = vector.extract_strided_slice %6 {offsets = [0, 8], sizes = [17, 8], strides = [1, 1]} : vector<17x16xf32> to vector<17x8xf32>
    %13 = vector.extract_strided_slice %12 {offsets = [0, 0], sizes = [15, 8], strides = [1, 1]} : vector<17x8xf32> to vector<15x8xf32>
    %14 = vector.extract_strided_slice %12 {offsets = [1, 0], sizes = [15, 8], strides = [1, 1]} : vector<17x8xf32> to vector<15x8xf32>
    %15 = vector.extract_strided_slice %12 {offsets = [2, 0], sizes = [15, 8], strides = [1, 1]} : vector<17x8xf32> to vector<15x8xf32>
    %16 = tpu.concatenate %13, %14, %15 in 1 : vector<15x8xf32>, vector<15x8xf32>, vector<15x8xf32> -> vector<15x24xf32>
    %17 = tpu.concatenate %11, %16 in 0 : vector<15x24xf32>, vector<15x24xf32> -> vector<30x24xf32>
    %c0_1 = arith.constant 0 : index
    %c0_2 = arith.constant 0 : index
    %c0_3 = arith.constant 0 : index
    %18 = vector.load %arg1[%c0_1, %c0_2, %c0_3] : memref<4x97x32xf32, #tpu.memory_space<vmem>>, vector<1x97x32xf32>
    %19 = vector.shape_cast %18 : vector<1x97x32xf32> to vector<97x32xf32>
    %20 = vector.extract_strided_slice %19 {offsets = [0, 0], sizes = [24, 32], strides = [1, 1]} : vector<97x32xf32> to vector<24x32xf32>
    %21 = vector.extract_strided_slice %19 {offsets = [96, 0], sizes = [1, 32], strides = [1, 1]} : vector<97x32xf32> to vector<1x32xf32>
    %cst_4 = arith.constant dense<0.000000e+00> : vector<30x32xf32>
    %22 = tpu.matmul %17, %20, %cst_4 {dimension_numbers = #tpu.dot_dimension_numbers<[1], [0], [0], [1], [0, 0, 1, 1], [], []>} : vector<30x24xf32>, vector<24x32xf32>, vector<30x32xf32> -> vector<30x32xf32>
    %23 = vector.broadcast %21 : vector<1x32xf32> to vector<30x32xf32>
    %24 = arith.addf %22, %23 : vector<30x32xf32>
    %cst_5 = arith.constant 0.000000e+00 : f32
    %25 = vector.broadcast %cst_5 : f32 to vector<30x32xf32>
    %26 = arith.cmpf ogt, %24, %25 : vector<30x32xf32>
    %cst_6 = arith.constant 0.000000e+00 : f32
    %27 = vector.broadcast %cst_6 : f32 to vector<30x32xf32>
    %28 = arith.minimumf %24, %27 : vector<30x32xf32>
    %29 = math.exp %28 : vector<30x32xf32>
    %cst_7 = arith.constant 1.000000e+00 : f32
    %30 = vector.broadcast %cst_7 : f32 to vector<30x32xf32>
    %31 = arith.subf %29, %30 : vector<30x32xf32>
    %32 = arith.select %26, %24, %31 : vector<30x32xi1>, vector<30x32xf32>
    %33 = vector.extract_strided_slice %32 {offsets = [0, 0], sizes = [15, 32], strides = [1, 1]} : vector<30x32xf32> to vector<15x32xf32>
    %34 = vector.extract_strided_slice %33 {offsets = [0, 0], sizes = [13, 32], strides = [1, 1]} : vector<15x32xf32> to vector<13x32xf32>
    %35 = vector.extract_strided_slice %33 {offsets = [1, 0], sizes = [13, 32], strides = [1, 1]} : vector<15x32xf32> to vector<13x32xf32>
    %36 = vector.extract_strided_slice %33 {offsets = [2, 0], sizes = [13, 32], strides = [1, 1]} : vector<15x32xf32> to vector<13x32xf32>
    %37 = tpu.concatenate %34, %35, %36 in 1 : vector<13x32xf32>, vector<13x32xf32>, vector<13x32xf32> -> vector<13x96xf32>
    %38 = vector.extract_strided_slice %32 {offsets = [15, 0], sizes = [15, 32], strides = [1, 1]} : vector<30x32xf32> to vector<15x32xf32>
    %39 = vector.extract_strided_slice %38 {offsets = [0, 0], sizes = [13, 32], strides = [1, 1]} : vector<15x32xf32> to vector<13x32xf32>
    %40 = vector.extract_strided_slice %38 {offsets = [1, 0], sizes = [13, 32], strides = [1, 1]} : vector<15x32xf32> to vector<13x32xf32>
    %41 = vector.extract_strided_slice %38 {offsets = [2, 0], sizes = [13, 32], strides = [1, 1]} : vector<15x32xf32> to vector<13x32xf32>
    %42 = tpu.concatenate %39, %40, %41 in 1 : vector<13x32xf32>, vector<13x32xf32>, vector<13x32xf32> -> vector<13x96xf32>
    %43 = tpu.concatenate %37, %42 in 0 : vector<13x96xf32>, vector<13x96xf32> -> vector<26x96xf32>
    %c1 = arith.constant 1 : index
    %c0_8 = arith.constant 0 : index
    %c0_9 = arith.constant 0 : index
    %44 = vector.load %arg1[%c1, %c0_8, %c0_9] : memref<4x97x32xf32, #tpu.memory_space<vmem>>, vector<1x97x32xf32>
    %45 = vector.shape_cast %44 : vector<1x97x32xf32> to vector<97x32xf32>
    %46 = vector.extract_strided_slice %45 {offsets = [0, 0], sizes = [96, 32], strides = [1, 1]} : vector<97x32xf32> to vector<96x32xf32>
    %47 = vector.extract_strided_slice %45 {offsets = [96, 0], sizes = [1, 32], strides = [1, 1]} : vector<97x32xf32> to vector<1x32xf32>
    %cst_10 = arith.constant dense<0.000000e+00> : vector<26x32xf32>
    %48 = tpu.matmul %43, %46, %cst_10 {dimension_numbers = #tpu.dot_dimension_numbers<[1], [0], [0], [1], [0, 0, 1, 1], [], []>} : vector<26x96xf32>, vector<96x32xf32>, vector<26x32xf32> -> vector<26x32xf32>
    %49 = vector.broadcast %47 : vector<1x32xf32> to vector<26x32xf32>
    %50 = arith.addf %48, %49 : vector<26x32xf32>
    %cst_11 = arith.constant 0.000000e+00 : f32
    %51 = vector.broadcast %cst_11 : f32 to vector<26x32xf32>
    %52 = arith.cmpf ogt, %50, %51 : vector<26x32xf32>
    %cst_12 = arith.constant 0.000000e+00 : f32
    %53 = vector.broadcast %cst_12 : f32 to vector<26x32xf32>
    %54 = arith.minimumf %50, %53 : vector<26x32xf32>
    %55 = math.exp %54 : vector<26x32xf32>
    %cst_13 = arith.constant 1.000000e+00 : f32
    %56 = vector.broadcast %cst_13 : f32 to vector<26x32xf32>
    %57 = arith.subf %55, %56 : vector<26x32xf32>
    %58 = arith.select %52, %50, %57 : vector<26x32xi1>, vector<26x32xf32>
    %59 = vector.extract_strided_slice %58 {offsets = [0, 0], sizes = [13, 32], strides = [1, 1]} : vector<26x32xf32> to vector<13x32xf32>
    %60 = vector.extract_strided_slice %59 {offsets = [0, 0], sizes = [1, 32], strides = [1, 1]} : vector<13x32xf32> to vector<1x32xf32>
    %61 = vector.extract_strided_slice %59 {offsets = [4, 0], sizes = [1, 32], strides = [1, 1]} : vector<13x32xf32> to vector<1x32xf32>
    %62 = vector.extract_strided_slice %59 {offsets = [8, 0], sizes = [1, 32], strides = [1, 1]} : vector<13x32xf32> to vector<1x32xf32>
    %63 = tpu.concatenate %60, %61, %62 in 0 : vector<1x32xf32>, vector<1x32xf32>, vector<1x32xf32> -> vector<3x32xf32>
    %64 = vector.extract_strided_slice %59 {offsets = [2, 0], sizes = [1, 32], strides = [1, 1]} : vector<13x32xf32> to vector<1x32xf32>
    %65 = vector.extract_strided_slice %59 {offsets = [6, 0], sizes = [1, 32], strides = [1, 1]} : vector<13x32xf32> to vector<1x32xf32>
    %66 = vector.extract_strided_slice %59 {offsets = [10, 0], sizes = [1, 32], strides = [1, 1]} : vector<13x32xf32> to vector<1x32xf32>
    %67 = tpu.concatenate %64, %65, %66 in 0 : vector<1x32xf32>, vector<1x32xf32>, vector<1x32xf32> -> vector<3x32xf32>
    %68 = vector.extract_strided_slice %59 {offsets = [4, 0], sizes = [1, 32], strides = [1, 1]} : vector<13x32xf32> to vector<1x32xf32>
    %69 = vector.extract_strided_slice %59 {offsets = [8, 0], sizes = [1, 32], strides = [1, 1]} : vector<13x32xf32> to vector<1x32xf32>
    %70 = vector.extract_strided_slice %59 {offsets = [12, 0], sizes = [1, 32], strides = [1, 1]} : vector<13x32xf32> to vector<1x32xf32>
    %71 = tpu.concatenate %68, %69, %70 in 0 : vector<1x32xf32>, vector<1x32xf32>, vector<1x32xf32> -> vector<3x32xf32>
    %72 = tpu.concatenate %63, %67, %71 in 1 : vector<3x32xf32>, vector<3x32xf32>, vector<3x32xf32> -> vector<3x96xf32>
    %73 = vector.extract_strided_slice %58 {offsets = [13, 0], sizes = [13, 32], strides = [1, 1]} : vector<26x32xf32> to vector<13x32xf32>
    %74 = vector.extract_strided_slice %73 {offsets = [0, 0], sizes = [1, 32], strides = [1, 1]} : vector<13x32xf32> to vector<1x32xf32>
    %75 = vector.extract_strided_slice %73 {offsets = [4, 0], sizes = [1, 32], strides = [1, 1]} : vector<13x32xf32> to vector<1x32xf32>
    %76 = vector.extract_strided_slice %73 {offsets = [8, 0], sizes = [1, 32], strides = [1, 1]} : vector<13x32xf32> to vector<1x32xf32>
    %77 = tpu.concatenate %74, %75, %76 in 0 : vector<1x32xf32>, vector<1x32xf32>, vector<1x32xf32> -> vector<3x32xf32>
    %78 = vector.extract_strided_slice %73 {offsets = [2, 0], sizes = [1, 32], strides = [1, 1]} : vector<13x32xf32> to vector<1x32xf32>
    %79 = vector.extract_strided_slice %73 {offsets = [6, 0], sizes = [1, 32], strides = [1, 1]} : vector<13x32xf32> to vector<1x32xf32>
    %80 = vector.extract_strided_slice %73 {offsets = [10, 0], sizes = [1, 32], strides = [1, 1]} : vector<13x32xf32> to vector<1x32xf32>
    %81 = tpu.concatenate %78, %79, %80 in 0 : vector<1x32xf32>, vector<1x32xf32>, vector<1x32xf32> -> vector<3x32xf32>
    %82 = vector.extract_strided_slice %73 {offsets = [4, 0], sizes = [1, 32], strides = [1, 1]} : vector<13x32xf32> to vector<1x32xf32>
    %83 = vector.extract_strided_slice %73 {offsets = [8, 0], sizes = [1, 32], strides = [1, 1]} : vector<13x32xf32> to vector<1x32xf32>
    %84 = vector.extract_strided_slice %73 {offsets = [12, 0], sizes = [1, 32], strides = [1, 1]} : vector<13x32xf32> to vector<1x32xf32>
    %85 = tpu.concatenate %82, %83, %84 in 0 : vector<1x32xf32>, vector<1x32xf32>, vector<1x32xf32> -> vector<3x32xf32>
    %86 = tpu.concatenate %77, %81, %85 in 1 : vector<3x32xf32>, vector<3x32xf32>, vector<3x32xf32> -> vector<3x96xf32>
    %87 = tpu.concatenate %72, %86 in 0 : vector<3x96xf32>, vector<3x96xf32> -> vector<6x96xf32>
    %c2 = arith.constant 2 : index
    %c0_14 = arith.constant 0 : index
    %c0_15 = arith.constant 0 : index
    %88 = vector.load %arg1[%c2, %c0_14, %c0_15] : memref<4x97x32xf32, #tpu.memory_space<vmem>>, vector<1x97x32xf32>
    %89 = vector.shape_cast %88 : vector<1x97x32xf32> to vector<97x32xf32>
    %90 = vector.extract_strided_slice %89 {offsets = [0, 0], sizes = [96, 32], strides = [1, 1]} : vector<97x32xf32> to vector<96x32xf32>
    %91 = vector.extract_strided_slice %89 {offsets = [96, 0], sizes = [1, 32], strides = [1, 1]} : vector<97x32xf32> to vector<1x32xf32>
    %cst_16 = arith.constant dense<0.000000e+00> : vector<6x32xf32>
    %92 = tpu.matmul %87, %90, %cst_16 {dimension_numbers = #tpu.dot_dimension_numbers<[1], [0], [0], [1], [0, 0, 1, 1], [], []>} : vector<6x96xf32>, vector<96x32xf32>, vector<6x32xf32> -> vector<6x32xf32>
    %93 = vector.broadcast %91 : vector<1x32xf32> to vector<6x32xf32>
    %94 = arith.addf %92, %93 : vector<6x32xf32>
    %cst_17 = arith.constant 0.000000e+00 : f32
    %95 = vector.broadcast %cst_17 : f32 to vector<6x32xf32>
    %96 = arith.cmpf ogt, %94, %95 : vector<6x32xf32>
    %cst_18 = arith.constant 0.000000e+00 : f32
    %97 = vector.broadcast %cst_18 : f32 to vector<6x32xf32>
    %98 = arith.minimumf %94, %97 : vector<6x32xf32>
    %99 = math.exp %98 : vector<6x32xf32>
    %cst_19 = arith.constant 1.000000e+00 : f32
    %100 = vector.broadcast %cst_19 : f32 to vector<6x32xf32>
    %101 = arith.subf %99, %100 : vector<6x32xf32>
    %102 = arith.select %96, %94, %101 : vector<6x32xi1>, vector<6x32xf32>
    %103 = vector.extract_strided_slice %102 {offsets = [0, 0], sizes = [3, 32], strides = [1, 1]} : vector<6x32xf32> to vector<3x32xf32>
    %104 = vector.extract_strided_slice %103 {offsets = [0, 0], sizes = [1, 32], strides = [1, 1]} : vector<3x32xf32> to vector<1x32xf32>
    %105 = vector.extract_strided_slice %103 {offsets = [1, 0], sizes = [1, 32], strides = [1, 1]} : vector<3x32xf32> to vector<1x32xf32>
    %106 = vector.extract_strided_slice %103 {offsets = [2, 0], sizes = [1, 32], strides = [1, 1]} : vector<3x32xf32> to vector<1x32xf32>
    %107 = tpu.concatenate %104, %105, %106 in 1 : vector<1x32xf32>, vector<1x32xf32>, vector<1x32xf32> -> vector<1x96xf32>
    %108 = vector.extract_strided_slice %102 {offsets = [3, 0], sizes = [3, 32], strides = [1, 1]} : vector<6x32xf32> to vector<3x32xf32>
    %109 = vector.extract_strided_slice %108 {offsets = [0, 0], sizes = [1, 32], strides = [1, 1]} : vector<3x32xf32> to vector<1x32xf32>
    %110 = vector.extract_strided_slice %108 {offsets = [1, 0], sizes = [1, 32], strides = [1, 1]} : vector<3x32xf32> to vector<1x32xf32>
    %111 = vector.extract_strided_slice %108 {offsets = [2, 0], sizes = [1, 32], strides = [1, 1]} : vector<3x32xf32> to vector<1x32xf32>
    %112 = tpu.concatenate %109, %110, %111 in 1 : vector<1x32xf32>, vector<1x32xf32>, vector<1x32xf32> -> vector<1x96xf32>
    %113 = tpu.concatenate %107, %112 in 0 : vector<1x96xf32>, vector<1x96xf32> -> vector<2x96xf32>
    %c3 = arith.constant 3 : index
    %c0_20 = arith.constant 0 : index
    %c0_21 = arith.constant 0 : index
    %114 = vector.load %arg1[%c3, %c0_20, %c0_21] : memref<4x97x32xf32, #tpu.memory_space<vmem>>, vector<1x97x32xf32>
    %115 = vector.shape_cast %114 : vector<1x97x32xf32> to vector<97x32xf32>
    %116 = vector.extract_strided_slice %115 {offsets = [0, 0], sizes = [96, 32], strides = [1, 1]} : vector<97x32xf32> to vector<96x32xf32>
    %117 = vector.extract_strided_slice %115 {offsets = [96, 0], sizes = [1, 32], strides = [1, 1]} : vector<97x32xf32> to vector<1x32xf32>
    %cst_22 = arith.constant dense<0.000000e+00> : vector<2x32xf32>
    %118 = tpu.matmul %113, %116, %cst_22 {dimension_numbers = #tpu.dot_dimension_numbers<[1], [0], [0], [1], [0, 0, 1, 1], [], []>} : vector<2x96xf32>, vector<96x32xf32>, vector<2x32xf32> -> vector<2x32xf32>
    %119 = vector.broadcast %117 : vector<1x32xf32> to vector<2x32xf32>
    %120 = arith.addf %118, %119 : vector<2x32xf32>
    %cst_23 = arith.constant 0.000000e+00 : f32
    %121 = vector.broadcast %cst_23 : f32 to vector<2x32xf32>
    %122 = arith.cmpf ogt, %120, %121 : vector<2x32xf32>
    %cst_24 = arith.constant 0.000000e+00 : f32
    %123 = vector.broadcast %cst_24 : f32 to vector<2x32xf32>
    %124 = arith.minimumf %120, %123 : vector<2x32xf32>
    %125 = math.exp %124 : vector<2x32xf32>
    %cst_25 = arith.constant 1.000000e+00 : f32
    %126 = vector.broadcast %cst_25 : f32 to vector<2x32xf32>
    %127 = arith.subf %125, %126 : vector<2x32xf32>
    %128 = arith.select %122, %120, %127 : vector<2x32xi1>, vector<2x32xf32>
    %c0_26 = arith.constant 0 : index
    %c0_27 = arith.constant 0 : index
    %129 = vector.load %arg2[%c0_26, %c0_27] : memref<33x10xf32, #tpu.memory_space<vmem>>, vector<33x10xf32>
    %130 = vector.extract_strided_slice %129 {offsets = [0, 0], sizes = [32, 10], strides = [1, 1]} : vector<33x10xf32> to vector<32x10xf32>
    %cst_28 = arith.constant dense<0.000000e+00> : vector<2x10xf32>
    %131 = tpu.matmul %128, %130, %cst_28 {dimension_numbers = #tpu.dot_dimension_numbers<[1], [0], [0], [1], [0, 0, 1, 1], [], []>} : vector<2x32xf32>, vector<32x10xf32>, vector<2x10xf32> -> vector<2x10xf32>
    %132 = vector.extract_strided_slice %129 {offsets = [32, 0], sizes = [1, 10], strides = [1, 1]} : vector<33x10xf32> to vector<1x10xf32>
    %133 = vector.broadcast %132 : vector<1x10xf32> to vector<2x10xf32>
    %134 = arith.addf %131, %133 : vector<2x10xf32>
    %c0_29 = arith.constant 0 : index
    %c0_30 = arith.constant 0 : index
    %135 = vector.load %arg3[%c0_29, %c0_30] : memref<2x10xf32, #tpu.memory_space<vmem>>, vector<2x10xf32>
    tpu.vector_store %arg3[%c0_29, %c0_30], %134 {strides = array<i32>} : memref<2x10xf32, #tpu.memory_space<vmem>>, vector<2x10xf32>,
    return
  }
}

</mosaic_0001>

<bundles_post_ra>
// kernel: surname_classifier_forward.1
= control target key start
LH: loop header
LB: loop body
LE: loop exit
PB: predicated region body
PF: predicated region fallthrough
CT: control target
= control target key end

     0   :  { %vm32_vm0 = vcmask 138240   ;;  %v1276_v2 = vmov 0.0|0.0   ;;  %vm1277_vm2 = vmmov 0   ;;  %v1278_v4 = vmov 0.0   ;;  %s1585_s0 = inlined_call_operand.vmem [shape: f32[16,17], index: 0, kind: input, shape index: {}]   ;;  %s1586_s1 = inlined_call_operand.vmem [shape: f32[4,97,32], index: 1, kind: input, shape index: {}]   ;;  %s1587_s2 = inlined_call_operand.vmem [shape: f32[33,10], index: 2, kind: input, shape index: {}]   ;;  %s1588_s3 = inlined_call_operand.hbm [shape: f32[2,10], index: 3, kind: output, shape index: {}]  }
   0x1   :  { %v15_v0 = vld [vmem:[%s1585_s0] sm:$0xff]  ;;  %v16_v1 = vld [vmem:[%s1585_s0 + $0x8] sm:$0xff]  ;;  %1149 = vmatprep.subr.bf16.mxu0 %v1276_v2  ;;  %vm1151_vm1 = vmpackc.low %vm32_vm0, %vm32_vm0  ;;  %1033 = vmatprep.mubr.msk.f32.mxu0 %vm1277_vm2, %v1278_v4  ;;  %v17_v5 = vlaneseq }
   0x2   :  { %v1150_v3 = vpack.c.bf16 %v16_v1, %v15_v0 }
   0x3   :  { %8 = vsyncpa [#allocation3], 0  ;;  %v18_v6 = vshrl.u32 %v17_v5, 7  ;;  %v22_v7 = vand.u32 127, %v17_v5  ;;  %v184_v13 = vld [vmem:[%s1586_s1] sm:$0xff]  ;;  %v185_v14 = vld [vmem:[%s1586_s1 + $0x8] sm:$0xff] }
   0x4   :  { %1152 = vmatpush3.bf16.xpose.msk.msra.mxu0 %vm1151_vm1, %v1150_v3  ;;  %v1153_v15 = vpack.c.bf16 %v185_v14, %v184_v13  ;;  %v186_v16 = vld [vmem:[%s1586_s1 + $0x10] sm:$0xff]  ;;  %s1279_s21 = smov 120   ;;  %vm141_vm6 = vcmask 1045504   ;;  %s1280_s22 = smov 8   ;;  %vm130_vm7 = vcmask 1046528   ;;  %vm153_vm8 = vcmask 64512  }
   0x5   :  { %vm23_vm3 = vcmp.eq.s32.totalorder %v18_v6, %v22_v7  ;;  %v19_v8 = vadd.s32 8, %v18_v6  ;;  %v20_v10 = vadd.s32 16, %v18_v6  ;;  %s1281_s23 = smov 16   ;;  %vm156_vm9 = vcmask 130048   ;;  %v914_v51 = vld [vmem:[%s1586_s1 + $0x68] sm:$0xff]  ;;  %v915_v52 = vld [vmem:[%s1586_s1 + $0x70] sm:$0xff] }
   0x6   :  { %v897_v9 = vsel %vm23_vm3, 1.0, %v1278_v4  ;;  %1154 = vmatprep.subr.bf16.mxu0 %v1153_v15  ;;  %vm192_vm10 = vcmask 195584   ;;  %v916_v53 = vld [vmem:[%s1586_s1 + $0x78] sm:$0xff]  ;;  %v1157_v54 = vpack.c.bf16 %v915_v52, %v914_v51  ;;  %v917_v55 = vld [vmem:[%s1586_s1 + $0x80] sm:$0xff]  ;;  %vm332_vm15 = vcmask 261120   ;;  %s1284_s7 = smov [#allocation2]  }
   0x7   :  { %vm24_vm4 = vcmp.eq.s32.totalorder %v19_v8, %v22_v7  ;;  %vm25_vm5 = vcmp.eq.s32.totalorder %v20_v10, %v22_v7  ;;  %v1161_v56 = vpack.c.bf16 %v917_v55, %v916_v53  ;;  %v905_v57 = vld [vmem:[%s1586_s1 + $0x60] ss:$0 sm:$0xff]  ;;  %v919_v10 = vld [vmem:[%s1586_s1 + $0x90] sm:$0xff]  ;;  %vm335_vm1 = vcmask 523264   ;;  %s889_s8 = sshll.u32 %s1284_s7, 4  ;;  %s890_s8 = int_to_ptr.vmem [resolvable:$true] %s889_s8 }
   0x8   :  { %v898_v11 = vsel %vm24_vm4, 1.0, %v1278_v4  ;;  %v899_v12 = vsel %vm25_vm5, 1.0, %v1278_v4  ;;  %1158 = vmatprep.subr.bf16.mxu1 %v1157_v54  ;;  %vm379_vm3 = vcmask 1044480   ;;  %p1257_p1 = scmp.lt.s32.totalorder %s890_s8, %s890_s8 }
   0x9   :  { %1160 = vmatpush3.bf16.msra.mxu1 %v1157_v54 }
   0xa   :  { %1162 = vmatprep.subr.bf16.mxu1 %v1161_v56 }
   0xb   :  { %1034 = vmatmul.mubr.msk.f32.vlgmr.msra.gmra.mrb[0].mxu0 %vm32_vm0, %v897_v9  ;;  %v918_v9 = vld [vmem:[%s1586_s1 + $0x88] sm:$0xff] }
   0xc   :  { %1036 = vmatprep.mubr.msk.f32.mxu0 %vm1277_vm2, %v1278_v4  ;;  %1156 = vmatpush3.bf16.msra.mxu0 %v1153_v15  ;;  %v920_v15 = vld [vmem:[%s1586_s1 + $0x98] sm:$0xff] }
   0xd   :  { %1046 = vmatprep.subr.mxu0 %v186_v16  ;;  %1164 = vmatpush3.bf16.msra.mxu1 %v1161_v56 }
   0xf   :  { %1037 = vmatmul.mubr.msk.f32.gmra.mrb[2].mxu0 %vm32_vm0, %v898_v11 }
  0x10   :  { %1039 = vmatprep.mubr.msk.f32.mxu0 %vm1277_vm2, %v1278_v4  ;;  %1047 = vmatpush3.msra.mxu0 %v186_v16  ;;  %v921_v16 = vld [vmem:[%s1586_s1 + $0xa0] sm:$0xff] }
  0x11   :  { %1181 = vmatprep.subr.bf16.mxu0 %v1276_v2 }
  0x13   :  { %1040 = vmatmul.mubr.msk.f32.gmra.mrb[4].mxu0 %vm32_vm0, %v899_v12  ;;  %v1165_v12 = vpack.c.bf16 %v919_v10, %v918_v9  ;;  %vm399_vm0 = vcmask 785408  }
  0x15   :  { %1166 = vmatprep.subr.bf16.mxu1 %v1165_v12 }
  0x16   :  { %1168 = vmatpush3.bf16.msra.mxu1 %v1165_v12  ;;  %v936_v12 = vld [vmem:[%s1586_s1 + $0xd0] sm:$0xff] }
  0xde   :  { %v114_v17 = vpop.f32.mrb[0].mxu0 }
  0xdf   :  { %159 = vrot.lane.b32.xlu0 %v114_v17, %s1279_s21  ;;  %v1035_v18 = vpop.f32.mrb[1].mxu0  ;;  %v142_v20 = vrot.slane %v114_v17, 2  ;;  %v131_v25 = vrot.slane %v114_v17, 1 }
  0xe2   :  { %v119_v19 = vpop.f32.mrb[2].mxu0 }
  0xe3   :  { %v143_v21 = vrot.slane %v119_v19, 2  ;;  %v1038_v22 = vpop.f32.mrb[3].mxu0  ;;  %v132_v23 = vrot.slane %v119_v19, 1 }
  0xe4   :  { %v923_v22 = vld [vmem:[%s1586_s1 + $0xb0] sm:$0xff] }
  0xe5   :  { %136 = vrot.lane.b32.xlu1 %v132_v23, %s1280_s22  ;;  %v144_v24 = vsel %vm141_vm6, %v142_v20, %v143_v21  ;;  %v133_v29 = vsel %vm130_vm7, %v131_v25, %v132_v23 }
  0xe6   :  { %167 = vrot.lane.b32.xlu0 %v144_v24, %s1280_s22  ;;  %v124_v26 = vpop.f32.mrb[4].mxu0 }
  0xe7   :  { %v145_v27 = vrot.slane %v124_v26, 2  ;;  %v1041_v28 = vpop.f32.mrb[5].mxu0 }
  0xe9   :  { %134 = vrot.lane.b32.xlu1 %v133_v29, %s1280_s22  ;;  %v146_v30 = vsel %vm141_vm6, %v143_v21, %v145_v27  ;;  %v922_v21 = vld [vmem:[%s1586_s1 + $0xa8] sm:$0xff] }
  0xea   :  { %147 = vrot.lane.b32.xlu0 %v144_v24, %s1281_s23  ;;  %v1173_v24 = vpack.c.bf16 %v923_v22, %v922_v21  ;;  %v942_v21 = vld [vmem:[%s1586_s1 + $0x100] sm:$0xff]  ;;  %v943_v22 = vld [vmem:[%s1586_s1 + $0x108] sm:$0xff] }
  0xed   :  { %149 = vrot.lane.b32.xlu1 %v146_v30, %s1281_s23  ;;  %s1283_s23 = smov 64  }
  0xee   :  { %161 = vrot.lane.b32.xlu0 %v119_v19, %s1279_s21 }
  0xf1   :  { %169 = vrot.lane.b32.xlu1 %v146_v30, %s1280_s22  ;;  %v925_v30 = vld [vmem:[%s1586_s1 + $0xc0] sm:$0xff]  ;;  %s1282_s22 = smov 32  }
 0x151   :  { %v160_v31 = vpop.permute.xlu0 %159 }
 0x152   :  { %v173_v34 = vsel %vm153_vm8, %v160_v31, %v133_v29  ;;  %v924_v29 = vld [vmem:[%s1586_s1 + $0xb8] sm:$0xff] }
 0x153   :  { %v1177_v31 = vpack.c.bf16 %v925_v30, %v924_v29 }
 0x157   :  { %v137_v32 = vpop.permute.xlu1 %136 }
 0x158   :  { %v168_v33 = vpop.permute.xlu0 %167  ;;  %v155_v40 = vsel %vm153_vm8, %v119_v19, %v137_v32 }
 0x159   :  { %v175_v36 = vsel %vm156_vm9, %v173_v34, %v168_v33 }
 0x15a   :  { %v179_v41 = vrot.slane %v175_v36, 1 }
 0x15b   :  { %v135_v35 = vpop.permute.xlu1 %134 }
 0x15c   :  { %v154_v37 = vsel %vm153_vm8, %v114_v17, %v135_v35  ;;  %v148_v38 = vpop.permute.xlu0 %147  ;;  %v1169_v17 = vpack.c.bf16 %v921_v16, %v920_v15  ;;  %v939_v16 = vld [vmem:[%s1586_s1 + $0xe8] sm:$0xff] }
 0x15d   :  { %v157_v39 = vsel %vm156_vm9, %v154_v37, %v148_v38 }
 0x15e   :  { %1048 = vmatprep.mubr.msk.f32.mxu0 %vm192_vm10, %v157_v39  ;;  %1170 = vmatprep.subr.bf16.mxu1 %v1169_v17 }
 0x15f   :  { %v150_v42 = vpop.permute.xlu1 %149  ;;  %1172 = vmatpush3.bf16.msra.mxu1 %v1169_v17 }
 0x160   :  { %v158_v43 = vsel %vm156_vm9, %v155_v40, %v150_v42  ;;  %v162_v44 = vpop.permute.xlu0 %161  ;;  %1174 = vmatprep.subr.bf16.mxu1 %v1173_v24 }
 0x161   :  { %v183_v45 = vsel %vm130_vm7, %v158_v43, %v179_v41  ;;  %v174_v46 = vsel %vm153_vm8, %v162_v44, %v132_v23 }
 0x162   :  { %1049 = vmatmul.mubr.msk.f32.vlgmr.msra.gmra.mrb[6].mxu0 %vm192_vm10, %v183_v45 }
 0x163   :  { %v170_v47 = vpop.permute.xlu1 %169  ;;  %1176 = vmatpush3.bf16.msra.mxu1 %v1173_v24  ;;  %v927_v24 = vld [vmem:[%s1586_s1 + $0xc8] ss:$0 sm:$0xff] }
 0x164   :  { %v176_v48 = vsel %vm156_vm9, %v174_v46, %v170_v47  ;;  %1178 = vmatprep.subr.bf16.mxu1 %v1177_v31 }
 0x165   :  { %v180_v49 = vrot.slane %v176_v48, 1 }
 0x167   :  { %v181_v50 = vsel %vm130_vm7, %v179_v41, %v180_v49  ;;  %1180 = vmatpush3.bf16.msra.mxu1 %v1177_v31 }
 0x168   :  { %1051 = vmatprep.mubr.msk.f32.mxu0 %vm192_vm10, %v181_v50  ;;  %1199 = vmatprep.subr.bf16.mxu1 %v1276_v2 }
 0x169   :  { %1052 = vmatmul.mubr.msk.f32.gmra.mrb[8].mxu0 %vm192_vm10, %v180_v49  ;;  %vm588_vm10 = vcmask 1042432  }
 0x16a   :  { %1108 = vmatprep.mubr.msk.f32.mxu0 %vm1277_vm2, %v1278_v4 }
 0x235   :  { %v1050_v58 = vpop.f32.mrb[6].mxu0 }
 0x236   :  { %v275_v59 = vadd.f32 %v1050_v58, %v905_v57  ;;  %v269_v60 = vpop.f32.mrb[7].mxu0 }
 0x237   :  { %v270_v61 = vadd.f32 %v905_v57, %v269_v60 }
 0x238   :  { %v293_v62 = vmin.f32 %v275_v59, 0.0  ;;  %vm289_vm11 = vcmp.gt.f32.partialorder %v275_v59, 0.0 }
 0x239   :  { %v292_v63 = vmin.f32 %v270_v61, 0.0  ;;  %vm288_vm12 = vcmp.gt.f32.partialorder %v270_v61, 0.0 }
 0x23a   :  { %v298_v0 = vmul.f32 1.442695, %v293_v62 }
 0x23b   :  { %v296_v1 = vmul.f32 1.442695, %v292_v63 }
 0x23c   :  { %1232 = vpow2.f32 %v298_v0  ;;  %v1053_v3 = vpop.f32.mrb[8].mxu0 }
 0x23d   :  { %1234 = vpow2.f32 %v296_v1  ;;  %v285_v5 = vadd.f32 %v1053_v3, %v905_v57  ;;  %v279_v6 = vpop.f32.mrb[9].mxu0 }
 0x23e   :  { %v280_v7 = vadd.f32 %v905_v57, %v279_v6 }
 0x23f   :  { %v295_v8 = vmin.f32 %v285_v5, 0.0  ;;  %vm291_vm13 = vcmp.gt.f32.partialorder %v285_v5, 0.0 }
 0x240   :  { %v294_v11 = vmin.f32 %v280_v7, 0.0  ;;  %vm290_vm14 = vcmp.gt.f32.partialorder %v280_v7, 0.0 }
 0x241   :  { %v302_v13 = vmul.f32 1.442695, %v295_v8 }
 0x242   :  { %v300_v14 = vmul.f32 1.442695, %v294_v11 }
 0x243   :  { %1236 = vpow2.f32 %v302_v13  ;;  %v937_v13 = vld [vmem:[%s1586_s1 + $0xd8] sm:$0xff] }
 0x244   :  { %1238 = vpow2.f32 %v300_v14  ;;  %v938_v14 = vld [vmem:[%s1586_s1 + $0xe0] sm:$0xff]  ;;  %v1182_v15 = vpack.c.bf16 %v937_v13, %v936_v12 }
 0x245   :  { %v1185_v17 = vpack.c.bf16 %v939_v16, %v938_v14 }
 0x246   :  { %v1233_v18 = vpop.eup %1232  ;;  %1183 = vmatpush3.bf16.msra.mxu0 %v1182_v15 }
 0x247   :  { %v1235_v19 = vpop.eup %1234  ;;  %v911_v20 = vadd.f32 -1.0, %v1233_v18  ;;  %1184 = vmatprep.subr.bf16.mxu0 %v1276_v2  ;;  %v940_v18 = vld [vmem:[%s1586_s1 + $0xf0] sm:$0xff] }
 0x248   :  { %v910_v23 = vadd.f32 -1.0, %v1235_v19  ;;  %v941_v19 = vld [vmem:[%s1586_s1 + $0xf8] sm:$0xff] }
 0x249   :  { %v1388_v25 = vsel %vm289_vm11, %v275_v59, %v911_v20  ;;  %v1188_v20 = vpack.c.bf16 %v941_v19, %v940_v18 }
 0x24a   :  { %v308_v26 = vsel %vm288_vm12, %v270_v61, %v910_v23  ;;  %v315_v27 = vrot.slane %v1388_v25, 1  ;;  %v324_v34 = vrot.slane %v1388_v25, 2  ;;  %1186 = vmatpush3.bf16.msra.mxu0 %v1185_v17  ;;  %v1191_v23 = vpack.c.bf16 %v943_v22, %v942_v21 }
 0x24b   :  { %v314_v28 = vrot.slane %v308_v26, 1  ;;  %v323_v35 = vrot.slane %v308_v26, 2  ;;  %1187 = vmatprep.subr.bf16.mxu0 %v1276_v2  ;;  %vm881_vm12 = vcmask 74752  }
 0x24c   :  { %319 = vrot.lane.b32.xlu1 %v315_v27, %s1282_s22 }
 0x24d   :  { %v1237_v32 = vpop.eup %1236  ;;  %v316_v33 = vsel %vm130_vm7, %v314_v28, %v315_v27  ;;  %v325_v41 = vsel %vm141_vm6, %v323_v35, %v324_v34 }
 0x24e   :  { %v1239_v36 = vpop.eup %1238  ;;  %v913_v37 = vadd.f32 -1.0, %v1237_v32  ;;  %317 = vrot.lane.b32.xlu0 %v316_v33, %s1282_s22  ;;  %1189 = vmatpush3.bf16.msra.mxu0 %v1188_v20 }
 0x24f   :  { %v912_v38 = vadd.f32 -1.0, %v1239_v36  ;;  %1190 = vmatprep.subr.bf16.mxu0 %v1276_v2 }
 0x250   :  { %v311_v39 = vsel %vm291_vm13, %v285_v5, %v913_v37  ;;  %328 = vrot.lane.b32.xlu1 %v324_v34, %s1283_s23 }
 0x251   :  { %v310_v40 = vsel %vm290_vm14, %v280_v7, %v912_v38  ;;  %v341_v42 = vrot.slane %v311_v39, 1  ;;  %v353_v46 = vrot.slane %v311_v39, 2 }
 0x252   :  { %326 = vrot.lane.b32.xlu0 %v325_v41, %s1283_s23  ;;  %v340_v43 = vrot.slane %v310_v40, 1  ;;  %v352_v45 = vrot.slane %v310_v40, 2  ;;  %1192 = vmatpush3.bf16.msra.mxu0 %v1191_v23  ;;  %v944_v41 = vld [vmem:[%s1586_s1 + $0x110] sm:$0xff] }
 0x253   :  { %1193 = vmatprep.subr.bf16.mxu0 %v1276_v2 }
 0x254   :  { %v342_v44 = vsel %vm130_vm7, %v340_v43, %v341_v42  ;;  %v354_v47 = vsel %vm141_vm6, %v352_v45, %v353_v46  ;;  %vm527_vm7 = vcmask 1041408  }
 0x255   :  { %345 = vrot.lane.b32.xlu1 %v342_v44, %s1282_s22 }
 0x256   :  { %343 = vrot.lane.b32.xlu0 %v340_v43, %s1282_s22 }
 0x259   :  { %357 = vrot.lane.b32.xlu1 %v354_v47, %s1283_s23 }
 0x25a   :  { %355 = vrot.lane.b32.xlu0 %v352_v45, %s1283_s23 }
 0x25d   :  { %359 = vrot.lane.b32.xlu1 %v353_v46, %s1283_s23 }
 0x25e   :  { %347 = vrot.lane.b32.xlu0 %v341_v42, %s1282_s22  ;;  %v945_v42 = vld [vmem:[%s1586_s1 + $0x118] sm:$0xff] }
 0x25f   :  { %v1194_v44 = vpack.c.bf16 %v945_v42, %v944_v41  ;;  %v958_v41 = vld [vmem:[%s1586_s1 + $0x168] sm:$0xff]  ;;  %v959_v42 = vld [vmem:[%s1586_s1 + $0x170] sm:$0xff] }
 0x261   :  { %1195 = vmatpush3.bf16.msra.mxu0 %v1194_v44  ;;  %v960_v44 = vld [vmem:[%s1586_s1 + $0x178] sm:$0xff] }
 0x262   :  { %1196 = vmatprep.subr.bf16.mxu0 %v1276_v2 }
 0x2be   :  { %v320_v48 = vpop.permute.xlu1 %319 }
 0x2bf   :  { %v334_v0 = vsel %vm332_vm15, %v1388_v25, %v320_v48 }
 0x2c0   :  { %v318_v49 = vpop.permute.xlu0 %317 }
 0x2c1   :  { %v333_v51 = vsel %vm332_vm15, %v308_v26, %v318_v49 }
 0x2c2   :  { %v329_v50 = vpop.permute.xlu1 %328 }
 0x2c3   :  { %v337_v1 = vsel %vm335_vm1, %v334_v0, %v329_v50 }
 0x2c4   :  { %v327_v52 = vpop.permute.xlu0 %326 }
 0x2c5   :  { %v336_v53 = vsel %vm335_vm1, %v333_v51, %v327_v52  ;;  %v946_v51 = vld [vmem:[%s1586_s1 + $0x120] sm:$0xff]  ;;  %v947_v52 = vld [vmem:[%s1586_s1 + $0x128] sm:$0xff] }
 0x2c6   :  { %1078 = vmatprep.mubr.msk.f32.mxu1 %vm399_vm0, %v336_v53 }
 0x2c7   :  { %v346_v54 = vpop.permute.xlu1 %345 }
 0x2c8   :  { %v344_v55 = vpop.permute.xlu0 %343  ;;  %v365_v56 = vsel %vm332_vm15, %v310_v40, %v346_v54 }
 0x2c9   :  { %v364_v58 = vsel %vm332_vm15, %v1388_v25, %v344_v55 }
 0x2cb   :  { %v358_v57 = vpop.permute.xlu1 %357 }
 0x2cc   :  { %v368_v59 = vsel %vm335_vm1, %v365_v56, %v358_v57  ;;  %v356_v60 = vpop.permute.xlu0 %355 }
 0x2cd   :  { %v374_v61 = vrot.slane %v368_v59, 2  ;;  %v367_v62 = vsel %vm335_vm1, %v364_v58, %v356_v60 }
 0x2ce   :  { %v373_v63 = vrot.slane %v367_v62, 2  ;;  %v1197_v62 = vpack.c.bf16 %v947_v52, %v946_v51 }
 0x2cf   :  { %v360_v6 = vpop.permute.xlu1 %359 }
 0x2d0   :  { %v348_v3 = vpop.permute.xlu0 %347  ;;  %v375_v5 = vsel %vm141_vm6, %v373_v63, %v374_v61  ;;  %1198 = vmatpush3.bf16.msra.mxu0 %v1197_v62 }
 0x2d1   :  { %v366_v7 = vsel %vm332_vm15, %v311_v39, %v348_v3  ;;  %v380_v8 = vsel %vm379_vm3, %v337_v1, %v375_v5  ;;  %1217 = vmatprep.subr.bf16.mxu0 %v1276_v2 }
 0x2d2   :  { %v369_v9 = vsel %vm335_vm1, %v366_v7, %v360_v6  ;;  %1079 = vmatmul.mubr.msk.f32.vlgmr.msra.gmra.mrb[0].mxu1 %vm399_vm0, %v380_v8 }
 0x2d3   :  { %v376_v10 = vrot.slane %v369_v9, 2 }
 0x2d5   :  { %v377_v11 = vsel %vm141_vm6, %v374_v61, %v376_v10  ;;  %vm525_vm6 = vcmask 1040384  }
 0x2d6   :  { %1081 = vmatprep.mubr.msk.f32.mxu1 %vm399_vm0, %v377_v11 }
 0x2d7   :  { %1082 = vmatmul.mubr.msk.f32.gmra.mrb[2].mxu1 %vm399_vm0, %v376_v10 }
 0x2d8   :  { %1135 = vmatprep.mubr.msk.f32.mxu1 %vm1277_vm2, %v1278_v4 }
 0x3a5   :  { %v1080_v25 = vpop.f32.mrb[0].mxu1 }
 0x3a6   :  { %v482_v26 = vadd.f32 %v1080_v25, %v927_v24  ;;  %v476_v27 = vpop.f32.mrb[1].mxu1 }
 0x3a7   :  { %v477_v28 = vadd.f32 %v927_v24, %v476_v27 }
 0x3a8   :  { %v500_v29 = vmin.f32 %v482_v26, 0.0  ;;  %vm496_vm4 = vcmp.gt.f32.partialorder %v482_v26, 0.0 }
 0x3a9   :  { %v499_v30 = vmin.f32 %v477_v28, 0.0  ;;  %vm495_vm5 = vcmp.gt.f32.partialorder %v477_v28, 0.0 }
 0x3aa   :  { %v505_v31 = vmul.f32 1.442695, %v500_v29  ;;  %v1083_v32 = vpop.f32.mrb[2].mxu1 }
 0x3ab   :  { %v503_v33 = vmul.f32 1.442695, %v499_v30  ;;  %v492_v34 = vadd.f32 %v1083_v32, %v927_v24  ;;  %v486_v35 = vpop.f32.mrb[3].mxu1 }
 0x3ac   :  { %1240 = vpow2.f32 %v505_v31  ;;  %v487_v36 = vadd.f32 %v927_v24, %v486_v35  ;;  %v954_v35 = vld [vmem:[%s1586_s1 + $0x148] sm:$0xff] }
 0x3ad   :  { %1242 = vpow2.f32 %v503_v33  ;;  %v502_v37 = vmin.f32 %v492_v34, 0.0  ;;  %vm498_vm8 = vcmp.gt.f32.partialorder %v492_v34, 0.0  ;;  %v952_v33 = vld [vmem:[%s1586_s1 + $0x138] sm:$0xff] }
 0x3ae   :  { %v501_v38 = vmin.f32 %v487_v36, 0.0  ;;  %vm497_vm9 = vcmp.gt.f32.partialorder %v487_v36, 0.0 }
 0x3af   :  { %v509_v39 = vmul.f32 1.442695, %v502_v37  ;;  %v955_v37 = vld [vmem:[%s1586_s1 + $0x150] sm:$0xff] }
 0x3b0   :  { %v507_v40 = vmul.f32 1.442695, %v501_v38  ;;  %v1203_v38 = vpack.c.bf16 %v955_v37, %v954_v35 }
 0x3b1   :  { %1244 = vpow2.f32 %v509_v39  ;;  %v957_v39 = vld [vmem:[%s1586_s1 + $0x160] sm:$0xff] }
 0x3b2   :  { %1246 = vpow2.f32 %v507_v40 }
 0x3b6   :  { %v1241_v43 = vpop.eup %1240 }
 0x3b7   :  { %v1243_v45 = vpop.eup %1242  ;;  %v933_v46 = vadd.f32 -1.0, %v1241_v43  ;;  %v1209_v43 = vpack.c.bf16 %v959_v42, %v958_v41 }
 0x3b8   :  { %v932_v47 = vadd.f32 -1.0, %v1243_v45  ;;  %v961_v45 = vld [vmem:[%s1586_s1 + $0x180] sm:$0xff] }
 0x3b9   :  { %v516_v48 = vsel %vm496_vm4, %v482_v26, %v933_v46  ;;  %v1212_v46 = vpack.c.bf16 %v961_v45, %v960_v44 }
 0x3ba   :  { %v515_v49 = vsel %vm495_vm5, %v477_v28, %v932_v47  ;;  %v537_v50 = vrot.slane %v516_v48, 7  ;;  %v539_v60 = vrot.slane %v516_v48, 2  ;;  %v523_v61 = vrot.slane %v516_v48, 6  ;;  %v949_v47 = vld [vmem:[%s1586_s1 + $0x130] ss:$0 sm:$0xff] }
 0x3bb   :  { %v1245_v53 = vpop.eup %1244  ;;  %v535_v54 = vrot.slane %v515_v49, 4  ;;  %v529_v55 = vrot.slane %v515_v49, 2  ;;  %v531_v56 = vrot.slane %v515_v49, 5  ;;  %v520_v57 = vrot.slane %v515_v49, 3 }
 0x3bc   :  { %v1247_v58 = vpop.eup %1246  ;;  %v935_v59 = vadd.f32 -1.0, %v1245_v53  ;;  %v553_v10 = vrot.slane %v516_v48, 5  ;;  %v962_v53 = vld [vmem:[%s1586_s1 + $0x188] sm:$0xff] }
 0x3bd   :  { %v934_v63 = vadd.f32 -1.0, %v1247_v58  ;;  %v541_v0 = vsel %vm525_vm6, %v535_v54, %v537_v50  ;;  %v533_v1 = vsel %vm525_vm6, %v529_v55, %v531_v56  ;;  %v526_v3 = vsel %vm525_vm6, %v515_v49, %v520_v57  ;;  %v963_v54 = vld [vmem:[%s1586_s1 + $0x190] sm:$0xff] }
 0x3be   :  { %v518_v5 = vsel %vm498_vm8, %v492_v34, %v935_v59  ;;  %v542_v6 = vsel %vm527_vm7, %v541_v0, %v539_v60  ;;  %v534_v7 = vsel %vm527_vm7, %v533_v1, %v516_v48  ;;  %v528_v8 = vsel %vm527_vm7, %v526_v3, %v523_v61  ;;  %v953_v34 = vld [vmem:[%s1586_s1 + $0x140] sm:$0xff] }
 0x3bf   :  { %v517_v9 = vsel %vm497_vm9, %v487_v36, %v934_v63  ;;  %v571_v15 = vrot.slane %v518_v5, 7  ;;  %v1200_v36 = vpack.c.bf16 %v953_v34, %v952_v33  ;;  %v1215_v55 = vpack.c.bf16 %v963_v54, %v962_v53  ;;  %v799_v5 = vld [vmem:[%s1587_s2] sm:$0xff] }
 0x3c0   :  { %v566_v11 = vrot.slane %v517_v9, 1  ;;  %v568_v12 = vrot.slane %v517_v9, 4  ;;  %v560_v13 = vrot.slane %v517_v9, 2  ;;  %v562_v14 = vrot.slane %v517_v9, 5 }
 0x3c1   :  { %v556_v16 = vrot.slane %v517_v9, 3  ;;  %v558_v17 = vsel %vm525_vm6, %v553_v10, %v517_v9  ;;  %1201 = vmatpush3.bf16.msra.mxu1 %v1200_v36  ;;  %v802_v9 = vld [vmem:[%s1587_s2 + $0x18] sm:$0xff] }
 0x3c2   :  { %v573_v18 = vsel %vm525_vm6, %v566_v11, %v568_v12  ;;  %v564_v19 = vsel %vm525_vm6, %v537_v50, %v560_v13  ;;  %1202 = vmatprep.subr.bf16.mxu1 %v1276_v2  ;;  %v965_v11 = vld [vmem:[%s1586_s1 + $0x198] ss:$0 sm:$0xff] }
 0x3c3   :  { %v574_v20 = vsel %vm527_vm7, %v573_v18, %v571_v15  ;;  %v565_v21 = vsel %vm527_vm7, %v564_v19, %v562_v14  ;;  %v559_v22 = vsel %vm527_vm7, %v558_v17, %v556_v16  ;;  %v968_v19 = vld [vmem:[%s1587_s2 + $0x20] ss:$0 sm:$0xff] }
 0x3c4   :  { %580 = vrot.lane.b32.xlu1 %v574_v20, %s1283_s23  ;;  %576 = vrot.lane.b32.xlu0 %v565_v21, %s1282_s22 }
 0x3c5   :  { %1204 = vmatpush3.bf16.msra.mxu1 %v1203_v38 }
 0x3c6   :  { %1205 = vmatprep.subr.bf16.mxu1 %v1276_v2 }
 0x3c8   :  { %548 = vrot.lane.b32.xlu1 %v542_v6, %s1283_s23  ;;  %544 = vrot.lane.b32.xlu0 %v534_v7, %s1282_s22  ;;  %v800_v6 = vld [vmem:[%s1587_s2 + $0x8] sm:$0xff] }
 0x3c9   :  { %v1218_v7 = vpack.c.bf16 %v800_v6, %v799_v5 }
 0x436   :  { %v581_v23 = vpop.permute.xlu1 %580  ;;  %v577_v24 = vpop.permute.xlu0 %576 }
 0x437   :  { %v583_v25 = vsel %vm332_vm15, %v559_v22, %v577_v24 }
 0x438   :  { %v584_v26 = vsel %vm335_vm1, %v583_v25, %v581_v23 }
 0x439   :  { %v586_v29 = vrot.slane %v584_v26, 5 }
 0x43a   :  { %v549_v27 = vpop.permute.xlu1 %548  ;;  %v545_v28 = vpop.permute.xlu0 %544 }
 0x43b   :  { %v551_v30 = vsel %vm332_vm15, %v528_v8, %v545_v28  ;;  %v801_v8 = vld [vmem:[%s1587_s2 + $0x10] sm:$0xff] }
 0x43c   :  { %v552_v31 = vsel %vm335_vm1, %v551_v30, %v549_v27  ;;  %v1221_v10 = vpack.c.bf16 %v802_v9, %v801_v8 }
 0x43d   :  { %v589_v32 = vsel %vm588_vm10, %v552_v31, %v586_v29 }
 0x43e   :  { %1109 = vmatmul.mubr.msk.f32.vlgmr.msra.gmra.mrb[10].mxu0 %vm399_vm0, %v589_v32 }
 0x43f   :  { %1146 = vmatprep.mubr.msk.f32.mxu0 %vm1277_vm2, %v1278_v4  ;;  %v956_v4 = vld [vmem:[%s1586_s1 + $0x158] sm:$0xff]  ;;  %1219 = vmatpush3.bf16.msra.mxu0 %v1218_v7  ;;  %s1252_s1 = scalar_lea.vmem %s890_s8, 32 }
 0x440   :  { %v1206_v40 = vpack.c.bf16 %v957_v39, %v956_v4  ;;  %1220 = vmatprep.subr.bf16.mxu0 %v1276_v2  ;;  %p1253_p0 = scmp.ne.s32.totalorder %s890_s8, %s1252_s1  ;;  %p1258_p2 = scmp.lt.s32.totalorder %s1252_s1, %s1252_s1 }
 0x442   :  { %1207 = vmatpush3.bf16.msra.mxu1 %v1206_v40  ;;  %p1259_p3 = por %p1258_p2, %p1257_p1 }
 0x443   :  { %1208 = vmatprep.subr.bf16.mxu1 %v1276_v2  ;;  %1222 = vmatpush3.bf16.msra.mxu0 %v1221_v10 }
 0x444   :  { %p1260_p4 = pnand %p1259_p3, %p1253_p0 }
 0x446   :  { %1210 = vmatpush3.bf16.msra.mxu1 %v1209_v43 }
 0x447   :  { %1211 = vmatprep.subr.bf16.mxu1 %v1276_v2 }
 0x44a   :  { %1213 = vmatpush3.bf16.msra.mxu1 %v1212_v46 }
 0x44b   :  { %1214 = vmatprep.subr.bf16.mxu1 %v1276_v2 }
 0x44e   :  { %1216 = vmatpush3.bf16.msra.mxu1 %v1215_v55 }
 0x511   :  { %v677_v48 = vpop.f32.mrb[10].mxu0 }
 0x512   :  { %v678_v49 = vadd.f32 %v949_v47, %v677_v48  ;;  %v1110_v50 = vpop.f32.mrb[11].mxu0 }
 0x514   :  { %v682_v51 = vmin.f32 %v678_v49, 0.0  ;;  %vm681_vm2 = vcmp.gt.f32.partialorder %v678_v49, 0.0 }
 0x516   :  { %v683_v52 = vmul.f32 1.442695, %v682_v51 }
 0x518   :  { %1248 = vpow2.f32 %v683_v52 }
 0x522   :  { %v1249_v56 = vpop.eup %1248 }
 0x523   :  { %v951_v57 = vadd.f32 -1.0, %v1249_v56 }
 0x525   :  { %v686_v58 = vsel %vm681_vm2, %v678_v49, %v951_v57 }
 0x526   :  { %v692_v59 = vrot.slane %v686_v58, 2  ;;  %v688_v60 = vrot.slane %v686_v58, 1 }
 0x528   :  { %693 = vrot.lane.b32.xlu1 %v692_v59, %s1283_s23  ;;  %689 = vrot.lane.b32.xlu0 %v688_v60, %s1282_s22 }
 0x59a   :  { %v694_v61 = vpop.permute.xlu1 %693  ;;  %v690_v62 = vpop.permute.xlu0 %689 }
 0x59b   :  { %v696_v63 = vsel %vm332_vm15, %v686_v58, %v690_v62 }
 0x59c   :  { %v697_v0 = vsel %vm335_vm1, %v696_v63, %v694_v61 }
 0x59d   :  { %v699_v1 = vrot.slane %v697_v0, 2 }
 0x59f   :  { %v701_v3 = vsel %vm525_vm6, %v697_v0, %v699_v1 }
 0x5a0   :  { %1136 = vmatmul.mubr.msk.f32.vlgmr.msra.gmra.mrb[4].mxu1 %vm399_vm0, %v701_v3 }
 0x673   :  { %v789_v12 = vpop.f32.mrb[4].mxu1 }
 0x674   :  { %v790_v13 = vadd.f32 %v965_v11, %v789_v12  ;;  %v1137_v14 = vpop.f32.mrb[5].mxu1 }
 0x676   :  { %v794_v15 = vmin.f32 %v790_v13, 0.0  ;;  %vm793_vm11 = vcmp.gt.f32.partialorder %v790_v13, 0.0 }
 0x678   :  { %v795_v16 = vmul.f32 1.442695, %v794_v15 }
 0x67a   :  { %1250 = vpow2.f32 %v795_v16 }
 0x684   :  { %v1251_v2 = vpop.eup %1250 }
 0x685   :  { %v967_v17 = vadd.f32 -1.0, %v1251_v2 }
 0x687   :  { %v798_v18 = vsel %vm793_vm11, %v790_v13, %v967_v17 }
 0x688   :  { %1147 = vmatmul.mubr.msk.f32.vlgmr.msra.gmra.mrb[12].mxu0 %vm332_vm15, %v798_v18 }
 0x75b   :  { %v877_v20 = vpop.f32.mrb[12].mxu0 }
 0x75c   :  { %v878_v21 = vadd.f32 %v968_v19, %v877_v20  ;;  %v1148_v22 = vpop.f32.mrb[13].mxu0 }
 0x75e   :  { %882 = vst.msk [vmem:[#allocation2] sm:$0x3] %vm881_vm12, %v878_v21 }
 0x75f   :  { %1263 = shalt.err (!%p1260_p4)
}
 0x760   :  { %s1264_s11 = scalar_lea.hbm %s1588_s3, 32 }
 0x761   :  { %p1265_p5 = scmp.ne.s32.totalorder %s1588_s3, %s1264_s11  ;;  %p1268_p6 = scmp.lt.u32.totalorder %s1264_s11, %s1588_s3 }
 0x763   :  { %p1270_p7 = pnand %p1268_p6, %p1265_p5 }
 0x765   :  { %1273 = shalt.err (!%p1270_p7)
}
 0x766   :  { %892 = dma.vmem_to_hbm [thread:$0]  %s890_s8, 32, %s1588_s3, [#allocation3]  }
 0x767   :  { %1274 = dma.done.wait [#allocation3], 32  }
 0x768   :  { %1275 = vsyncadd [#allocation3], 4294967264 }
 0x769   :  { %896 = vsyncpa [#allocation3], 1 }

</bundles_post_ra>
